<compile_context>
chip_gen: v7x
topology: tpu7x:2x2x1
jax: 0.10.0
libtpu: 0.0.40
codegen_flags: <defaults>
</compile_context>

<pallas_src>
import jax
import jax.numpy as jnp
from jax.experimental import pallas as pl
from jax.experimental.pallas import tpu as pltpu

_LANE = 128


def _round_up(n, m):
    return ((n + m - 1) // m) * m


def _sequential_kernel(x_ref, w1_ref, b1_ref, w2_ref, b2_ref, o_ref):
    # Linear 1: bf16 x bf16 -> f32 accumulation on the MXU.
    h = jnp.dot(x_ref[...], w1_ref[...], preferred_element_type=jnp.float32)
    # Bias add + ReLU kept in f32 on the VPU (v5e has no bf16 VPU path).
    h = jnp.maximum(h + b1_ref[...], 0.0)
    # Linear 2: cast the activation back to bf16 for the MXU, accumulate in f32.
    y = jnp.dot(h.astype(jnp.bfloat16), w2_ref[...],
                preferred_element_type=jnp.float32)
    # Lane-dense (TM, 128) store -> unmasked vst, full output DMA bandwidth.
    o_ref[...] = (y + b2_ref[...]).astype(o_ref.dtype)


def sequential_forward(x, w1, b1, w2, b2, *, tm=None):
    """Fused [Linear, ReLU, Linear] forward pass as one batch-tiled Pallas kernel."""
    batch, in_dim = x.shape
    hidden = w1.shape[1]
    out_dim = w2.shape[1]
    out_dtype = x.dtype

    # ---- tile sizing -------------------------------------------------------
    # TM capped so double-buffered x/out tiles + f32 intermediates stay far
    # under the v7x 32 MiB default scoped-VMEM limit (re-derived, not copied
    # from a v6e sweep).  For large batches this gives >=512-row tiles.
    if tm is None:
        tm = min(512, _round_up(batch, 8))
    tm = max(8, _round_up(tm, 8))
    padded_batch = _round_up(batch, tm)

    # Lane-dense padded output width (out_dim=16 would otherwise be an 8x-padded
    # masked store on every step).
    out_pad = _round_up(max(out_dim, _LANE), _LANE)

    # ---- host-side layout / dtype prep ------------------------------------
    if padded_batch != batch:
        x = jnp.pad(x, ((0, padded_batch - batch), (0, 0)))

    # bf16 MXU inputs; biases stay f32 (added to the f32 accumulator).
    x_bf = x.astype(jnp.bfloat16)
    w1_bf = w1.astype(jnp.bfloat16)
    w2_bf = jnp.pad(w2, ((0, 0), (0, out_pad - out_dim))).astype(jnp.bfloat16)
    b1_f = b1.astype(jnp.float32)
    b2_f = jnp.pad(b2, ((0, 0), (0, out_pad - out_dim))).astype(jnp.float32)

    grid = (padded_batch // tm,)

    flops = 2 * padded_batch * (in_dim * hidden + hidden * out_pad)
    bytes_accessed = (
        x_bf.size * 2                     # streamed activations (bf16)
        + padded_batch * out_pad * 4      # output slab writeback (f32)
        + w1_bf.size * 2 + w2_bf.size * 2 # resident weights (bf16)
        + b1_f.size * 4 + b2_f.size * 4   # resident biases (f32)
    )

    out = pl.pallas_call(
        _sequential_kernel,
        out_shape=jax.ShapeDtypeStruct((padded_batch, out_pad), jnp.float32),
        grid_spec=pl.GridSpec(
            grid=grid,
            in_specs=[
                # streamed per-step batch tile
                pl.BlockSpec((tm, in_dim), lambda i: (i, 0)),
                # weights / biases: same block every step -> VMEM-resident
                pl.BlockSpec((in_dim, hidden), lambda i: (0, 0)),
                pl.BlockSpec((1, hidden), lambda i: (0, 0)),
                pl.BlockSpec((hidden, out_pad), lambda i: (0, 0)),
                pl.BlockSpec((1, out_pad), lambda i: (0, 0)),
            ],
            out_specs=pl.BlockSpec((tm, out_pad), lambda i: (i, 0)),
        ),
        compiler_params=pltpu.CompilerParams(
            dimension_semantics=("parallel",)),
        cost_estimate=pl.CostEstimate(
            flops=flops, transcendentals=0, bytes_accessed=bytes_accessed),
    )(x_bf, w1_bf, b1_f, w2_bf, b2_f)

    # Slice the lane-dense slab back to the logical output shape.
    return out[:batch, :out_dim].astype(out_dtype)


if __name__ == "__main__":
    # Deterministic synthetic parameters (NOT a checkpoint load).
    key = jax.random.PRNGKey(0)
    k_x, k_w1, k_b1, k_w2, k_b2 = jax.random.split(key, 5)

    batch, in_dim, hidden, out_dim = 512, 32, 64, 16
    tm = 128  # 4 grid steps -> exercises the batch-tiled pipeline

    x = jax.random.normal(k_x, (batch, in_dim), dtype=jnp.float32)
    w1 = jax.random.normal(k_w1, (in_dim, hidden), dtype=jnp.float32) * 0.1
    b1 = jax.random.normal(k_b1, (1, hidden), dtype=jnp.float32) * 0.1
    w2 = jax.random.normal(k_w2, (hidden, out_dim), dtype=jnp.float32) * 0.1
    b2 = jax.random.normal(k_b2, (1, out_dim), dtype=jnp.float32) * 0.1

    out = sequential_forward(x, w1, b1, w2, b2, tm=tm)
    jax.block_until_ready(out)
    assert out.shape == (batch, out_dim)

    # Reference 1: identical bf16/f32 mixed-precision chain (tight tolerance).
    h_ref = jnp.maximum(
        jnp.dot(x.astype(jnp.bfloat16), w1.astype(jnp.bfloat16),
                preferred_element_type=jnp.float32) + b1, 0.0)
    ref_bf16 = jnp.dot(h_ref.astype(jnp.bfloat16), w2.astype(jnp.bfloat16),
                       preferred_element_type=jnp.float32) + b2
    assert jnp.allclose(out, ref_bf16, atol=1e-4, rtol=1e-4)

    # Reference 2: full-f32 chain (loose tolerance; bounds the bf16 input cast).
    ref_f32 = jnp.maximum(x @ w1 + b1, 0.0) @ w2 + b2
    assert jnp.allclose(out, ref_f32, atol=5e-2, rtol=5e-2)

    print("KERNEL_OK")
</pallas_src>

<mosaic_0001>
module attributes {stable_mosaic.version = 11 : i64} {
  func.func @_sequential_kernel(%arg0: i32, %arg1: memref<128x32xbf16, #tpu.memory_space<vmem>>, %arg2: memref<32x64xbf16, #tpu.memory_space<vmem>>, %arg3: memref<1x64xf32, #tpu.memory_space<vmem>>, %arg4: memref<64x128xbf16, #tpu.memory_space<vmem>>, %arg5: memref<1x128xf32, #tpu.memory_space<vmem>>, %arg6: memref<128x128xf32, #tpu.memory_space<vmem>>) attributes {dimension_semantics = [#tpu.dimension_semantics<parallel>], iteration_bounds = array<i64: 4>, scalar_prefetch = 0 : i64, scratch_operands = 0 : i64, tpu.core_type = #tpu.core_type<tc>, window_params = [{transform_indices = @transform_0, window_bounds = array<i64: 128, 32>}, {pipeline_mode = #tpu.pipeline_mode<synchronous>, transform_indices = @transform_1, window_bounds = array<i64: 32, 64>}, {pipeline_mode = #tpu.pipeline_mode<synchronous>, transform_indices = @transform_2, window_bounds = array<i64: 1, 64>}, {pipeline_mode = #tpu.pipeline_mode<synchronous>, transform_indices = @transform_3, window_bounds = array<i64: 64, 128>}, {pipeline_mode = #tpu.pipeline_mode<synchronous>, transform_indices = @transform_4, window_bounds = array<i64: 1, 128>}, {transform_indices = @transform_5, window_bounds = array<i64: 128, 128>}]} {
    %c0 = arith.constant 0 : index
    %c0_0 = arith.constant 0 : index
    %0 = vector.load %arg1[%c0, %c0_0] : memref<128x32xbf16, #tpu.memory_space<vmem>>, vector<128x32xbf16>
    %c0_1 = arith.constant 0 : index
    %c0_2 = arith.constant 0 : index
    %1 = vector.load %arg2[%c0_1, %c0_2] : memref<32x64xbf16, #tpu.memory_space<vmem>>, vector<32x64xbf16>
    %cst = arith.constant dense<0.000000e+00> : vector<128x64xf32>
    %2 = tpu.matmul %0, %1, %cst {dimension_numbers = #tpu.dot_dimension_numbers<[1], [0], [0], [1], [0, 0, 1, 1], [], []>} : vector<128x32xbf16>, vector<32x64xbf16>, vector<128x64xf32> -> vector<128x64xf32>
    %c0_3 = arith.constant 0 : index
    %c0_4 = arith.constant 0 : index
    %3 = vector.load %arg3[%c0_3, %c0_4] : memref<1x64xf32, #tpu.memory_space<vmem>>, vector<1x64xf32>
    %4 = vector.broadcast %3 : vector<1x64xf32> to vector<128x64xf32>
    %5 = arith.addf %2, %4 : vector<128x64xf32>
    %cst_5 = arith.constant 0.000000e+00 : f32
    %6 = vector.broadcast %cst_5 : f32 to vector<128x64xf32>
    %7 = arith.maximumf %5, %6 : vector<128x64xf32>
    %8 = arith.truncf %7 : vector<128x64xf32> to vector<128x64xbf16>
    %c0_6 = arith.constant 0 : index
    %c0_7 = arith.constant 0 : index
    %9 = vector.load %arg4[%c0_6, %c0_7] : memref<64x128xbf16, #tpu.memory_space<vmem>>, vector<64x128xbf16>
    %cst_8 = arith.constant dense<0.000000e+00> : vector<128x128xf32>
    %10 = tpu.matmul %8, %9, %cst_8 {dimension_numbers = #tpu.dot_dimension_numbers<[1], [0], [0], [1], [0, 0, 1, 1], [], []>} : vector<128x64xbf16>, vector<64x128xbf16>, vector<128x128xf32> -> vector<128x128xf32>
    %c0_9 = arith.constant 0 : index
    %c0_10 = arith.constant 0 : index
    %11 = vector.load %arg5[%c0_9, %c0_10] : memref<1x128xf32, #tpu.memory_space<vmem>>, vector<1x128xf32>
    %12 = vector.broadcast %11 : vector<1x128xf32> to vector<128x128xf32>
    %13 = arith.addf %10, %12 : vector<128x128xf32>
    %c0_11 = arith.constant 0 : index
    %c0_12 = arith.constant 0 : index
    %14 = vector.load %arg6[%c0_11, %c0_12] : memref<128x128xf32, #tpu.memory_space<vmem>>, vector<128x128xf32>
    tpu.vector_store %arg6[%c0_11, %c0_12], %13 {strides = array<i32>} : memref<128x128xf32, #tpu.memory_space<vmem>>, vector<128x128xf32>,
    return
  }
  func.func @transform_0(%arg0: i32) -> (i32, i32) {
    %c0_i32 = arith.constant 0 : i32
    %c0_i32_0 = arith.constant 0 : i32
    return %arg0, %c0_i32 : i32, i32
  }
  func.func @transform_1(%arg0: i32) -> (i32, i32) {
    %c0_i32 = arith.constant 0 : i32
    %c0_i32_0 = arith.constant 0 : i32
    %c0_i32_1 = arith.constant 0 : i32
    return %c0_i32, %c0_i32_0 : i32, i32
  }
  func.func @transform_2(%arg0: i32) -> (i32, i32) {
    %c0_i32 = arith.constant 0 : i32
    %c0_i32_0 = arith.constant 0 : i32
    %c0_i32_1 = arith.constant 0 : i32
    return %c0_i32, %c0_i32_0 : i32, i32
  }
  func.func @transform_3(%arg0: i32) -> (i32, i32) {
    %c0_i32 = arith.constant 0 : i32
    %c0_i32_0 = arith.constant 0 : i32
    %c0_i32_1 = arith.constant 0 : i32
    return %c0_i32, %c0_i32_0 : i32, i32
  }
  func.func @transform_4(%arg0: i32) -> (i32, i32) {
    %c0_i32 = arith.constant 0 : i32
    %c0_i32_0 = arith.constant 0 : i32
    %c0_i32_1 = arith.constant 0 : i32
    return %c0_i32, %c0_i32_0 : i32, i32
  }
  func.func @transform_5(%arg0: i32) -> (i32, i32) {
    %c0_i32 = arith.constant 0 : i32
    %c0_i32_0 = arith.constant 0 : i32
    return %arg0, %c0_i32 : i32, i32
  }
}

</mosaic_0001>

<bundles_post_ra>
// kernel: tpu_custom_call.1
= control target key start
LH: loop header
LB: loop body
LE: loop exit
PB: predicated region body
PF: predicated region fallthrough
CT: control target
= control target key end

     0   :  { %10 = vsyncpa [#allocation3], 0  ;;  %s1133_s0 = inlined_call_operand.vmem [shape: bf16[512,32], index: 0, kind: input, shape index: {}]   ;;  %s1134_s1 = inlined_call_operand.vmem [shape: bf16[32,64], index: 1, kind: input, shape index: {}]   ;;  %s1135_s2 = inlined_call_operand.vmem [shape: f32[1,64], index: 2, kind: input, shape index: {}]   ;;  %s1136_s3 = inlined_call_operand.vmem [shape: bf16[64,128], index: 3, kind: input, shape index: {}]   ;;  %s1137_s4 = inlined_call_operand.vmem [shape: f32[1,128], index: 4, kind: input, shape index: {}]   ;;  %s1138_s5 = inlined_call_operand.hbm [shape: f32[512,128], index: 5, kind: output, shape index: {}]  }
   0x1   :  { %12 = vsyncpa [#allocation3 + $0x1], 0  ;;  %s968_s18 = smov 0   ;;  %s970_s19 = smov 0  }
   0x2   :  { %s972_s20 = smov 0   ;;  %s974_s21 = smov 0  }
   0x3 LB: > { %s989_s22 = sadd.s32 4294967295, %s933_s21   ;;  %s705_s23 = sadd.s32 4294967294, %s933_s21   ;;  %s933_s21 = sphi %s974_s21, %s1144_s21   ;;  %s929_s20 = sphi %s972_s20, %s1143_s20   ;;  %s925_s19 = sphi %s970_s19, %s1142_s19   ;;  %s921_s18 = sphi %s968_s18, %s1141_s18  }
   0x4   : > { %s993_s24 = sadd.s32 1, %s933_s21   ;;  %s135_s25 = sadd.s32 1, %s929_s20 }
   0x5   : > { %s132_s26 = ssub.s32 %s933_s21, %s993_s24  ;;  %p145_p0 = scmp.ne.s32.totalorder %s929_s20, %s925_s19 }
   0x6   : > { %p133_p1 = scmp.eq.s32.totalorder %s132_s26, 0  ;;  %p146_p2 = scmp.eq.s32.totalorder %s989_s22, 3 }
   0x7   : > { %p151_p3 = scmp.ne.s32.totalorder %s925_s19, %s921_s18  ;;  %p152_p4 = scmp.eq.s32.totalorder %s705_s23, 3 }
   0x8   : > { %s1004_s27 = scalar_select %p133_p1, %s929_s20, %s135_s25  }
   0x9   : > { %p1006_p5 = por %p146_p2, %p145_p0  ;;  %p1010_p6 = por %p152_p4, %p151_p3 }
   0xa   : > { %p708_p7 = scmp.ge.s32.totalorder %s933_s21, 1  ;;  %p191_p8 = scmp.lt.s32.totalorder %s933_s21, 5 }
   0xc   : > { %p192_p9 = pnand %p708_p7, %p191_p8 }
   0xd   : > { %v857_v0 = vld [vmem:[%s1134_s1] sm:$0xff] (!%p192_p9)   ;;  %s710_s7 = sshll.u32 (!%p192_p9), %s989_s22, 4  ;;  %v858_v1 = vld [vmem:[%s1134_s1 + $0x8] sm:$0xff] (!%p192_p9)   ;;  %vm306_vm0 = vcmask (!%p192_p9), 261120   ;;  %v869_v12 = vld [vmem:[%s1136_s3 + $0x10] sm:$0xff] (!%p192_p9)   ;;  %vm491_vm1 = vcmask (!%p192_p9), 523264  }
   0xe   : > { %195 = sbr.rel (%p192_p9) target bundleno = 504 (0x1f8), region = 40  ;;  %p220_p10 = scmp.lt.s32.totalorder (!%p192_p9), %s710_s7, 63  ;;  %772 = vmatprep.subr.bf16.mxu0 (!%p192_p9), %v857_v0  ;;  %v867_v2 = vld [vmem:[%s1136_s3] sm:$0xff] (!%p192_p9)   ;;  %v868_v3 = vld [vmem:[%s1136_s3 + $0x8] sm:$0xff] (!%p192_p9)   ;;  %v870_v13 = vld [vmem:[%s1136_s3 + $0x18] sm:$0xff] (!%p192_p9)  }
   0xf   : > { %773 = vmatpush3.bf16.msra.mxu0 (!%p192_p9), %v857_v0  ;;  %792 = vmatprep.subr.bf16.mxu1 (!%p192_p9), %v867_v2  ;;  %v712_v14 = vld [vmem:[%s1135_s2] ss:$0 sm:$0xff] (!%p192_p9)  ;;  %s216_s8 = sand.u32 (!%p192_p9), 1, %s925_s19   ;;  %s749_s13 = sshll.u32 (!%p192_p9), %s989_s22, 11 }
  0x10   : > { %774 = vmatprep.subr.bf16.mxu0 (!%p192_p9), %v858_v1  ;;  %793 = vmatpush3.bf16.msra.mxu1 (!%p192_p9), %v867_v2  ;;  %s709_s9 = sshll.u32 (!%p192_p9), %s216_s8, 7  ;;  %s1092_s22 = scalar_lea.sflag (!%p192_p9), [#allocation3], %s216_s8 }
  0x11   : > { %794 = vmatprep.subr.bf16.mxu1 (!%p192_p9), %v868_v3  ;;  %s1063_s12 = scalar_lea.vmem (!%p192_p9), [#allocation2], %s709_s9  ;;  %s935_s25 = smov (!%p192_p9), [#allocation2]  }
  0x12   : > { %s875_s26 = sshll.u32 (!%p192_p9), %s935_s25, 4  ;;  %s876_s26 = int_to_ptr.vmem [resolvable:$false] %s875_s26 }
  0x13   : > { %775 = vmatpush3.bf16.msra.mxu0 (!%p192_p9), %v858_v1  ;;  %s877_s30 = scalar_lea.vmem (!%p192_p9), %s876_s26, 4096 }
  0x14   : > { %795 = vmatpush3.bf16.msra.mxu1 (!%p192_p9), %v868_v3 }
  0x15   : > { %s1146_s7 = smov (!%p220_p10, %s710_s7), 63  ;;  %796 = vmatprep.subr.bf16.mxu1 %v869_v12 }
  0x16   : > { %s711_s14 = sshll.u32 %s1146_s7, 2 }
  0x17   : > { %s223_s17 = scalar_lea.vmem %s1133_s0, %s711_s14  ;;  %s643_s14 = sshll.u32 %s1063_s12, 4  ;;  %s1085_s14 = int_to_ptr.vmem [resolvable:$true] %s643_s14 }
  0x18   : > { %v859_v4 = vld [vmem:[%s223_s17] sm:$0xff]   ;;  %v860_v5 = vld [vmem:[%s223_s17 + $0x8] sm:$0xff]   ;;  %v861_v6 = vld [vmem:[%s223_s17 + $0x10] sm:$0xff]   ;;  %797 = vmatpush3.bf16.msra.mxu1 %v869_v12  ;;  %s871_s23 = scalar_lea.vmem %s1085_s14, 2048  ;;  %p878_p0 = scmp.lt.s32.totalorder %s1085_s14, %s876_s26 }
  0x19   : > { %776 = vmatprep.mubr.msk.bf16.mxu0 %vm306_vm0, %v859_v4  ;;  %v862_v7 = vld [vmem:[%s223_s17 + $0x18] sm:$0xff]   ;;  %v863_v8 = vld [vmem:[%s223_s17 + $0x20] sm:$0xff]   ;;  %v864_v9 = vld [vmem:[%s223_s17 + $0x28] sm:$0xff]   ;;  %798 = vmatprep.subr.bf16.mxu1 %v870_v13  ;;  %p872_p11 = scmp.ne.s32.totalorder %s1085_s14, %s871_s23  ;;  %p879_p1 = scmp.lt.s32.totalorder %s877_s30, %s871_s23 }
  0x1a   : > { %777 = vmatmul.mubr.msk.bf16.vlgmr.msra.gmra.mrb[0].mxu0 %vm306_vm0, %v860_v5  ;;  %v865_v10 = vld [vmem:[%s223_s17 + $0x30] sm:$0xff]   ;;  %v866_v11 = vld [vmem:[%s223_s17 + $0x38] sm:$0xff]   ;;  %s1083_s17 = scalar_lea.hbm %s1138_s5, %s749_s13 }
  0x1b   : > { %780 = vmatprep.mubr.msk.bf16.mxu0 %vm306_vm0, %v861_v6  ;;  %p873_p12 = pnand %p872_p11, %p1006_p5  ;;  %p880_p2 = por %p879_p1, %p878_p0 }
  0x1c   : > { %799 = vmatpush3.bf16.msra.mxu1 %v870_v13 }
  0x1d   : > { %p874_p13 = pneg %p873_p12 }
  0x1f   : > { %p881_p3 = pnand %p880_p2, %p874_p13 }
  0x22   : > { %781 = vmatmul.mubr.msk.bf16.gmra.mrb[4].mxu0 %vm306_vm0, %v862_v7  ;;  %v731_v7 = vld [vmem:[%s1137_s4] ss:$0 sm:$0xff] }
  0x23   : > { %784 = vmatprep.mubr.msk.bf16.mxu0 %vm306_vm0, %v863_v8 }
  0x2a   : > { %785 = vmatmul.mubr.msk.bf16.gmra.mrb[8].mxu0 %vm306_vm0, %v864_v9 }
  0x2b   : > { %788 = vmatprep.mubr.msk.bf16.mxu0 %vm306_vm0, %v865_v10 }
  0x32   : > { %789 = vmatmul.mubr.msk.bf16.gmra.mrb[12].mxu0 %vm306_vm0, %v866_v11 }
  0xed   : > { %v778_v15 = vpop.f32.mrb[0].mxu0 }
  0xee   : > { %v374_v16 = vadd.f32 %v778_v15, %v712_v14  ;;  %v365_v17 = vpop.f32.mrb[1].mxu0 }
  0xef   : > { %v366_v18 = vadd.f32 %v712_v14, %v365_v17  ;;  %v779_v19 = vpop.f32.mrb[2].mxu0 }
  0xf0   : > { %v377_v20 = vadd.f32 %v779_v19, %v712_v14  ;;  %v368_v21 = vpop.f32.mrb[3].mxu0  ;;  %v430_v23 = vmax.f32 %v374_v16, 0.0 }
  0xf1   : > { %v369_v22 = vadd.f32 %v712_v14, %v368_v21  ;;  %v428_v25 = vmax.f32 %v366_v18, 0.0 }
  0xf2   : > { %v431_v24 = vmax.f32 %v377_v20, 0.0 }
  0xf3   : > { %v429_v26 = vmax.f32 %v369_v22, 0.0 }
  0xf4   : > { %v445_v27 = vpack.c.bf16 %v431_v24, %v430_v23 }
  0xf5   : > { %v782_v28 = vpop.f32.mrb[4].mxu0  ;;  %v444_v29 = vpack.c.bf16 %v429_v26, %v428_v25 }
  0xf6   : > { %v390_v30 = vadd.f32 %v782_v28, %v712_v14  ;;  %v381_v31 = vpop.f32.mrb[5].mxu0 }
  0xf7   : > { %v382_v32 = vadd.f32 %v712_v14, %v381_v31  ;;  %v783_v33 = vpop.f32.mrb[6].mxu0  ;;  %800 = vmatprep.mubr.msk.bf16.mxu1 %vm491_vm1, %v444_v29 }
  0xf8   : > { %v393_v34 = vadd.f32 %v783_v33, %v712_v14  ;;  %v384_v35 = vpop.f32.mrb[7].mxu0  ;;  %801 = vmatmul.mubr.msk.bf16.vlgmr.msra.gmra.mrb[0].mxu1 %vm491_vm1, %v445_v27  ;;  %v434_v37 = vmax.f32 %v390_v30, 0.0 }
  0xf9   : > { %v385_v36 = vadd.f32 %v712_v14, %v384_v35  ;;  %v432_v39 = vmax.f32 %v382_v32, 0.0 }
  0xfa   : > { %v435_v38 = vmax.f32 %v393_v34, 0.0 }
  0xfb   : > { %v433_v40 = vmax.f32 %v385_v36, 0.0 }
  0xfc   : > { %v447_v41 = vpack.c.bf16 %v435_v38, %v434_v37 }
  0xfd   : > { %v446_v42 = vpack.c.bf16 %v433_v40, %v432_v39  ;;  %v786_v43 = vpop.f32.mrb[8].mxu0 }
  0xfe   : > { %v406_v44 = vadd.f32 %v786_v43, %v712_v14  ;;  %v397_v45 = vpop.f32.mrb[9].mxu0 }
  0xff   : > { %v398_v46 = vadd.f32 %v712_v14, %v397_v45  ;;  %v787_v47 = vpop.f32.mrb[10].mxu0  ;;  %804 = vmatprep.mubr.msk.bf16.mxu1 %vm491_vm1, %v446_v42 }
 0x100   : > { %v409_v48 = vadd.f32 %v787_v47, %v712_v14  ;;  %v400_v49 = vpop.f32.mrb[11].mxu0  ;;  %805 = vmatmul.mubr.msk.bf16.gmra.mrb[4].mxu1 %vm491_vm1, %v447_v41  ;;  %v438_v51 = vmax.f32 %v406_v44, 0.0 }
 0x101   : > { %v401_v50 = vadd.f32 %v712_v14, %v400_v49  ;;  %v436_v53 = vmax.f32 %v398_v46, 0.0 }
 0x102   : > { %v439_v52 = vmax.f32 %v409_v48, 0.0 }
 0x103   : > { %v437_v54 = vmax.f32 %v401_v50, 0.0 }
 0x104   : > { %v449_v55 = vpack.c.bf16 %v439_v52, %v438_v51 }
 0x105   : > { %v448_v56 = vpack.c.bf16 %v437_v54, %v436_v53  ;;  %v790_v57 = vpop.f32.mrb[12].mxu0 }
 0x106   : > { %v422_v58 = vadd.f32 %v790_v57, %v712_v14  ;;  %v413_v59 = vpop.f32.mrb[13].mxu0 }
 0x107   : > { %v414_v60 = vadd.f32 %v712_v14, %v413_v59  ;;  %v791_v61 = vpop.f32.mrb[14].mxu0  ;;  %808 = vmatprep.mubr.msk.bf16.mxu1 %vm491_vm1, %v448_v56 }
 0x108   : > { %v425_v62 = vadd.f32 %v791_v61, %v712_v14  ;;  %v416_v63 = vpop.f32.mrb[15].mxu0  ;;  %809 = vmatmul.mubr.msk.bf16.gmra.mrb[8].mxu1 %vm491_vm1, %v449_v55  ;;  %v442_v1 = vmax.f32 %v422_v58, 0.0 }
 0x109   : > { %v417_v0 = vadd.f32 %v712_v14, %v416_v63  ;;  %v440_v3 = vmax.f32 %v414_v60, 0.0 }
 0x10a   : > { %v443_v2 = vmax.f32 %v425_v62, 0.0 }
 0x10b   : > { %v441_v4 = vmax.f32 %v417_v0, 0.0 }
 0x10c   : > { %v451_v5 = vpack.c.bf16 %v443_v2, %v442_v1 }
 0x10d   : > { %v450_v6 = vpack.c.bf16 %v441_v4, %v440_v3 }
 0x10f   : > { %812 = vmatprep.mubr.msk.bf16.mxu1 %vm491_vm1, %v450_v6 }
 0x110   : > { %813 = vmatmul.mubr.msk.bf16.gmra.mrb[12].mxu1 %vm491_vm1, %v451_v5 }
 0x1cb   : > { %v802_v8 = vpop.f32.mrb[0].mxu1 }
 0x1cc   : > { %v559_v9 = vadd.f32 %v802_v8, %v731_v7  ;;  %v550_v10 = vpop.f32.mrb[1].mxu1 }
 0x1cd   : > { %v551_v11 = vadd.f32 %v731_v7, %v550_v10  ;;  %v803_v12 = vpop.f32.mrb[2].mxu1 }
 0x1ce   : > { %615 = vst [vmem:[%s1063_s12 + $0x10] sm:$0xff] %v559_v9  ;;  %v562_v13 = vadd.f32 %v803_v12, %v731_v7  ;;  %v553_v14 = vpop.f32.mrb[3].mxu1 }
 0x1cf   : > { %613 = vst [vmem:[%s1063_s12] sm:$0xff] %v551_v11  ;;  %v554_v15 = vadd.f32 %v731_v7, %v553_v14 }
 0x1d0   : > { %616 = vst [vmem:[%s1063_s12 + $0x18] sm:$0xff] %v562_v13 }
 0x1d1   : > { %614 = vst [vmem:[%s1063_s12 + $0x8] sm:$0xff] %v554_v15 }
 0x1d3   : > { %v806_v16 = vpop.f32.mrb[4].mxu1 }
 0x1d4   : > { %v575_v17 = vadd.f32 %v806_v16, %v731_v7  ;;  %v566_v18 = vpop.f32.mrb[5].mxu1 }
 0x1d5   : > { %v567_v19 = vadd.f32 %v731_v7, %v566_v18  ;;  %v807_v20 = vpop.f32.mrb[6].mxu1 }
 0x1d6   : > { %619 = vst [vmem:[%s1063_s12 + $0x30] sm:$0xff] %v575_v17  ;;  %v578_v21 = vadd.f32 %v807_v20, %v731_v7  ;;  %v569_v22 = vpop.f32.mrb[7].mxu1 }
 0x1d7   : > { %617 = vst [vmem:[%s1063_s12 + $0x20] sm:$0xff] %v567_v19  ;;  %v570_v23 = vadd.f32 %v731_v7, %v569_v22 }
 0x1d8   : > { %620 = vst [vmem:[%s1063_s12 + $0x38] sm:$0xff] %v578_v21 }
 0x1d9   : > { %618 = vst [vmem:[%s1063_s12 + $0x28] sm:$0xff] %v570_v23 }
 0x1db   : > { %v810_v24 = vpop.f32.mrb[8].mxu1 }
 0x1dc   : > { %v591_v25 = vadd.f32 %v810_v24, %v731_v7  ;;  %v582_v26 = vpop.f32.mrb[9].mxu1 }
 0x1dd   : > { %v583_v27 = vadd.f32 %v731_v7, %v582_v26  ;;  %v811_v28 = vpop.f32.mrb[10].mxu1 }
 0x1de   : > { %623 = vst [vmem:[%s1063_s12 + $0x50] sm:$0xff] %v591_v25  ;;  %v594_v29 = vadd.f32 %v811_v28, %v731_v7  ;;  %v585_v30 = vpop.f32.mrb[11].mxu1 }
 0x1df   : > { %621 = vst [vmem:[%s1063_s12 + $0x40] sm:$0xff] %v583_v27  ;;  %v586_v31 = vadd.f32 %v731_v7, %v585_v30 }
 0x1e0   : > { %624 = vst [vmem:[%s1063_s12 + $0x58] sm:$0xff] %v594_v29 }
 0x1e1   : > { %622 = vst [vmem:[%s1063_s12 + $0x48] sm:$0xff] %v586_v31 }
 0x1e3   : > { %v814_v32 = vpop.f32.mrb[12].mxu1 }
 0x1e4   : > { %v607_v33 = vadd.f32 %v814_v32, %v731_v7  ;;  %v598_v34 = vpop.f32.mrb[13].mxu1 }
 0x1e5   : > { %v599_v35 = vadd.f32 %v731_v7, %v598_v34  ;;  %v815_v36 = vpop.f32.mrb[14].mxu1 }
 0x1e6   : > { %627 = vst [vmem:[%s1063_s12 + $0x70] sm:$0xff] %v607_v33  ;;  %v610_v37 = vadd.f32 %v815_v36, %v731_v7  ;;  %v601_v38 = vpop.f32.mrb[15].mxu1 }
 0x1e7   : > { %625 = vst [vmem:[%s1063_s12 + $0x60] sm:$0xff] %v599_v35  ;;  %v602_v39 = vadd.f32 %v731_v7, %v601_v38 }
 0x1e8   : > { %628 = vst [vmem:[%s1063_s12 + $0x78] sm:$0xff] %v610_v37 }
 0x1e9   : > { %626 = vst [vmem:[%s1063_s12 + $0x68] sm:$0xff] %v602_v39 }
 0x1ea   : > { %884 = shalt.err (!%p881_p3)
}
 0x1eb   : > { %s885_s6 = scalar_lea.hbm %s1083_s17, 2048  ;;  %s889_s9 = scalar_lea.hbm %s1138_s5, 8192 }
 0x1ec   : > { %p886_p4 = scmp.ne.s32.totalorder %s1083_s17, %s885_s6  ;;  %p890_p9 = scmp.lt.u32.totalorder %s1083_s17, %s1138_s5 }
 0x1ed   : > { %p891_p10 = scmp.lt.u32.totalorder %s889_s9, %s885_s6  ;;  %p893_p12 = scmp.lt.u32.totalorder %s885_s6, %s1083_s17 }
 0x1ee   : > { %p887_p7 = pnand %p886_p4, %p1006_p5 }
 0x1ef   : > { %p892_p11 = por %p891_p10, %p890_p9 }
 0x1f0   : > { %p888_p8 = pneg %p887_p7 }
 0x1f1   : > { %p894_p13 = por %p893_p12, %p892_p11 }
 0x1f3   : > { %p895_p0 = pnand %p894_p13, %p888_p8 }
 0x1f5   : > { %898 = shalt.err (!%p895_p0)
}
 0x1f6   : > { %s936_s12 = smov 128   ;;  %s937_s13 = smov 8  }
 0x1f7   : > { %816 = dma.vmem_to_hbm [thread:$0]  (%p1006_p5), %s1085_s14, 2048, %s1083_s17, %s1092_s22, %s936_s12, %s936_s12, %s937_s13  }
 0x1f8 PF: > { %p822_p1 = scmp.ge.s32.totalorder %s933_s21, 2  ;;  %s658_s15 = sand.u32 1, %s921_s18  }
 0x1f9   : > { %s659_s16 = scalar_lea.sflag [#allocation3], %s658_s15 }
 0x1fa   : > { %p819_p2 = pnand %p822_p1, %p1010_p6 }
 0x1fc   : > { %916 = dma.done.wait (!%p819_p2), %s659_s16, 2048  }
 0x1fd   : > { %918 = vsyncadd (!%p819_p2), %s659_s16, 4294965248  ;;  %p15_p3 = scmp.ge.s32.totalorder %s993_s24, 6   ;;  %s1141_s18 = smov %s925_s19 }
 0x1fe   : > { %s1142_s19 = smov %s929_s20  ;;  %s1143_s20 = smov %s1004_s27 }
 0x1ff   : > { %s1144_s21 = smov %s993_s24  ;;  %17 = sbr.rel (!%p15_p3) target bundleno = 3 (0x3), region = 75 }
 0x206   :  { %664 = vsyncpa [#allocation3], 1 }
 0x207   :  { %666 = vsyncpa [#allocation3 + $0x1], 1 }

</bundles_post_ra>
